<compile_context>
chip_gen: v7x
topology: tpu7x:2x2x1
jax: 0.10.0
libtpu: 0.0.40
codegen_flags: <defaults>
</compile_context>

<pallas_src>
import functools

import jax
import jax.numpy as jnp
import numpy as np
from jax.experimental import pallas as pl
from jax.experimental.pallas import tpu as pltpu

NUM_HIDDENS        = 32      # model_opt['num_hiddens']
EMBEDDING_DIM      = 16      # model_opt['embedding_dim']
NUM_EMBEDDINGS     = 64      # model_opt['num_embeddings']
COMMITMENT_COST    = 0.25    # model_opt['commitment_cost']
TARGET_TILE_PIXELS = 2048    # pixels of work per grid step (sweepable 512-2048)


def _round_up(x, m):
    return -(-x // m) * m


# --------------------------------------------------------------------------- #
# Fused kernel: (pre_vq 1x1 conv + VQ cross-term) -> argmin -> (codebook +
# suf_vq 1x1 conv decode table).  One grid step = F_TILE frames x TILE_HW px.
# --------------------------------------------------------------------------- #
def _fused_vq_kernel(bid_ref, x_ref, wcat_ref, bcat_ref, dect_ref,
                     out_ref, idx_ref, dmin_ref, *, e_dim, f_tile):
    """
    bid_ref  : [n_groups] int32 (SMEM scalar prefetch) — branch id per group
    x_ref    : [F_TILE, Ch, TILE_HW]  bf16   NCHW frame features
    wcat_ref : [3, E+K, Ch]           bf16   [wpre^T ; cb @ wpre^T]   (resident)
    bcat_ref : [3, E+K, 1]            f32    [bpre^T ; cb@bpre^T - 0.5|cb|^2]
    dect_ref : [3, Hh, K]             f32    (cb @ wsuf + bsuf)^T     (resident)
    out_ref  : [F_TILE, Hh, TILE_HW]  f32    quantized + suf_vq output
    idx_ref  : [F_TILE, 1, TILE_HW]   int32  encoding indices
    dmin_ref : [F_TILE, 1, TILE_HW]   f32    per-pixel |quantize - inputs|^2
    """
    g = pl.program_id(0)
    bid = bid_ref[g]                       # branch selection happens in-kernel
    wcat = wcat_ref[bid]                   # [E+K, Ch]  (bf16)
    bcat = bcat_ref[bid]                   # [E+K, 1]   (f32)
    dect = dect_ref[bid]                   # [Hh, K]    (f32)

    for f in range(f_tile):                # static unroll over frames in block
        x = x_ref[f]                                               # [Ch, TP] bf16

        # MXU matmul #1 (bf16 x bf16 -> f32 acc):
        #   rows [0,E)   = pre_vq features e
        #   rows [E,E+K) = cb·e - 0.5*|cb|^2
        r = jnp.dot(wcat, x, preferred_element_type=jnp.float32) + bcat
        e = r[:e_dim, :]                                           # [E, TP]
        half = r[e_dim:, :]                                        # [K, TP]

        ee = jnp.sum(e * e, axis=0, keepdims=True)                 # [1, TP]
        d = ee - 2.0 * half              # |e|^2 + |cb_k|^2 - 2 e·cb_k   [K, TP]

        d_min = jnp.min(d, axis=0, keepdims=True)                  # [1, TP]
        K, TP = d.shape
        iota_k = jax.lax.broadcasted_iota(jnp.int32, (K, TP), 0)
        idx = jnp.min(jnp.where(d == d_min, iota_k, K), axis=0,
                      keepdims=True)                               # first argmin
        onehot = (iota_k == idx).astype(jnp.float32)               # [K, TP]

        # MXU matmul #2 (f32): codebook lookup fused with suf_vq 1x1 conv.
        out = jnp.dot(dect, onehot, preferred_element_type=jnp.float32)

        out_ref[f] = out.astype(out_ref.dtype)
        idx_ref[f] = idx
        dmin_ref[f] = jnp.maximum(d_min, 0.0)   # clamp cancellation noise


def _fused_vq_pallas(x_all, branch_ids, wcat_all, bcat_all, dect_all,
                     e_dim, f_tile, tile_hw):
    """x_all: [N_pad, Ch, HW_pad] bf16; branch_ids: [N_pad // f_tile] int32."""
    N, C, HW = x_all.shape
    nB, EK, Ch = wcat_all.shape
    Hh, K = dect_all.shape[1], dect_all.shape[2]
    assert N % f_tile == 0 and HW % tile_hw == 0
    n_groups = N // f_tile
    hw_tiles = HW // tile_hw
    assert branch_ids.shape[0] == n_groups

    kernel = functools.partial(_fused_vq_kernel, e_dim=e_dim, f_tile=f_tile)
    out, idx, dmin = pl.pallas_call(
        kernel,
        out_shape=(jax.ShapeDtypeStruct((N, Hh, HW), jnp.float32),
                   jax.ShapeDtypeStruct((N, 1, HW), jnp.int32),
                   jax.ShapeDtypeStruct((N, 1, HW), jnp.float32)),
        grid_spec=pltpu.PrefetchScalarGridSpec(
            num_scalar_prefetch=1,
            grid=(n_groups, hw_tiles),
            in_specs=[
                pl.BlockSpec((f_tile, C, tile_hw), lambda g, j, bids: (g, 0, j)),
                # weight stacks: whole-array blocks, constant index_map -> DMA'd
                # once and kept resident in VMEM across the whole grid.
                pl.BlockSpec((nB, EK, Ch), lambda g, j, bids: (0, 0, 0)),
                pl.BlockSpec((nB, EK, 1),  lambda g, j, bids: (0, 0, 0)),
                pl.BlockSpec((nB, Hh, K),  lambda g, j, bids: (0, 0, 0)),
            ],
            out_specs=[
                pl.BlockSpec((f_tile, Hh, tile_hw), lambda g, j, bids: (g, 0, j)),
                pl.BlockSpec((f_tile, 1, tile_hw),  lambda g, j, bids: (g, 0, j)),
                pl.BlockSpec((f_tile, 1, tile_hw),  lambda g, j, bids: (g, 0, j)),
            ]),
        compiler_params=pltpu.CompilerParams(
            dimension_semantics=("parallel", "parallel"),  # no carried state
            vmem_limit_bytes=32 * 1024 * 1024),            # explicit for v5e
    )(branch_ids, x_all, wcat_all, bcat_all, dect_all)
    return out, idx, dmin


# --------------------------------------------------------------------------- #
# Wrapper: weight fusion, (transpose-free) layout plumbing, loss reduction.
# --------------------------------------------------------------------------- #
def _prep_branch_weights(params, name, cb, cbsq):
    HI = jax.lax.Precision.HIGHEST
    wpre = params[f"wpre_{name}"]   # [Ch, E]  (= Conv2d weight transposed)
    bpre = params[f"bpre_{name}"]   # [1, E]
    wsuf = params[f"wsuf_{name}"]   # [E, Hh]  (= ConvTranspose2d weight)
    bsuf = params[f"bsuf_{name}"]   # [1, Hh]
    wcat = jnp.concatenate(
        [wpre.T, jnp.dot(cb, wpre.T, precision=HI)], axis=0)              # [E+K, Ch]
    bcat = jnp.concatenate(
        [bpre.T, jnp.dot(cb, bpre.T, precision=HI) - 0.5 * cbsq], axis=0)  # [E+K, 1]
    dect = (jnp.dot(cb, wsuf, precision=HI) + bsuf).T                      # [Hh, K]
    return wcat, bcat, dect


def _choose_tiles(frame_shapes):
    """frame_shapes: list of (n_frames, C, hw). Static (trace-time) Python."""
    max_hw = max(s[2] for s in frame_shapes)
    tile_hw = min(TARGET_TILE_PIXELS, _round_up(max_hw, 128))
    hw_pad = _round_up(max_hw, tile_hw)
    hw_tiles = hw_pad // tile_hw
    min_frames = min(s[0] for s in frame_shapes)
    f_tile = max(1, min(TARGET_TILE_PIXELS // tile_hw, 8, min_frames))

    def n_steps(ft):
        return sum(_round_up(s[0], ft) // ft for s in frame_shapes) * hw_tiles

    # v7x megacore: keep >= 4 grid steps so both TensorCores get work.
    while f_tile > 1 and n_steps(f_tile) < 4:
        f_tile //= 2
    return tile_hw, hw_pad, hw_tiles, f_tile


def vqvae_quantize_forward(feat_bg, feat_id, feat_mo, params):
    """Mirrors the _generater quantization path (is_training=False branch).

    feat_* : [B, T, C, h, w] encoder outputs (encoders themselves not
    reproduced — see TODO above).  Returns quantize_* in [B, T, Hh, h, w]
    (NCHW per frame), tokens in [(B*T), h, w], and commitment losses.
    """
    feats = (("bg", feat_bg), ("id", feat_id), ("mo", feat_mo))
    cb = params["codebook"]                                   # [K, E]
    K, E = cb.shape
    cbsq = jnp.sum(cb * cb, axis=1, keepdims=True)            # [K, 1]

    # [B,T,C,h,w] -> [B*T, C, h*w]  (pure reshape: no data movement)
    frames, meta = [], {}
    for name, feat in feats:
        b, t, c, h, w = feat.shape
        frames.append(feat.reshape(b * t, c, h * w))
        meta[name] = (b, t, c, h, w)

    tile_hw, hw_pad, hw_tiles, f_tile = _choose_tiles([f.shape for f in frames])

    xs, bids, offs = [], [], {}
    wcat_l, bcat_l, dect_l = [], [], []
    off = 0
    for bi, (name, _) in enumerate(feats):
        fr = frames[bi]
        n_i, _, hw_i = fr.shape
        n_pad = _round_up(n_i, f_tile)
        # bf16 cast + pad + concat fuse into a single XLA copy (no transpose).
        fr = jnp.pad(fr.astype(jnp.bfloat16),
                     ((0, n_pad - n_i), (0, 0), (0, hw_pad - hw_i)))
        xs.append(fr)
        bids += [bi] * (n_pad // f_tile)
        offs[name] = (off, n_i, hw_i)
        off += n_pad
        wc, bc, de = _prep_branch_weights(params, name, cb, cbsq)
        wcat_l.append(wc); bcat_l.append(bc); dect_l.append(de)

    x_all = jnp.concatenate(xs, axis=0)                       # [N_pad, Ch, HW_pad]
    bids_arr = jnp.asarray(bids, dtype=jnp.int32)
    out_all, idx_all, dmin_all = _fused_vq_pallas(
        x_all, bids_arr,
        jnp.stack(wcat_l).astype(jnp.bfloat16),               # bf16 MXU operand
        jnp.stack(bcat_l), jnp.stack(dect_l),                 # f32 (keep accuracy)
        E, f_tile, tile_hw)

    Hh = out_all.shape[1]
    results = {}
    total_q_loss = jnp.float32(0.0)
    for name, _ in feats:
        b, t, c, h, w = meta[name]
        o, n_i, hw_i = offs[name]
        out_b = out_all[o:o + n_i, :, :hw_i]                  # [bt, Hh, hw]
        quant = out_b.reshape(b, t, Hh, h, w)                 # free reshape
        tokens = idx_all[o:o + n_i, 0, :hw_i].reshape(b * t, h, w)
        # VectorQuantizerEMA (inference): loss = commitment_cost * mse(quantize, inputs)
        # d_min == |quantize - inputs|^2 per pixel -> mean is sum(d_min)/(P*E).
        P = n_i * hw_i
        e_latent_loss = jnp.sum(dmin_all[o:o + n_i, 0, :hw_i]) / (P * E)
        q_loss = COMMITMENT_COST * e_latent_loss
        results[f"quantize_{name}"] = quant
        results[f"tokens_{name}"] = tokens
        results[f"quant_loss_{name}"] = q_loss
        total_q_loss = total_q_loss + q_loss
    results["quant_loss_total"] = total_q_loss
    return results


# --------------------------------------------------------------------------- #
# Parameters and references.
# --------------------------------------------------------------------------- #
def init_params(key):
    ks = jax.random.split(key, 8)
    p = {}
    # shared EMA codebook: [K, E]
    p["codebook"] = jax.random.normal(ks[0], (NUM_EMBEDDINGS, EMBEDDING_DIM),
                                      jnp.float32) * 0.5
    for i, name in enumerate(("bg", "id", "mo")):
        kw = jax.random.split(ks[1 + i], 4)
        # Conv2d(num_hiddens, embedding_dim, 1): weight [E, Ch, 1, 1] -> pass W^T [Ch, E]
        p[f"wpre_{name}"] = jax.random.normal(kw[0], (NUM_HIDDENS, EMBEDDING_DIM),
                                              jnp.float32) * 0.1
        p[f"bpre_{name}"] = jax.random.normal(kw[1], (1, EMBEDDING_DIM),
                                              jnp.float32) * 0.01
        # ConvTranspose2d(embedding_dim, num_hiddens, 1): weight [E, Hh, 1, 1] -> [E, Hh]
        p[f"wsuf_{name}"] = jax.random.normal(kw[2], (EMBEDDING_DIM, NUM_HIDDENS),
                                              jnp.float32) * 0.1
        p[f"bsuf_{name}"] = jax.random.normal(kw[3], (1, NUM_HIDDENS),
                                              jnp.float32) * 0.01
    return p


def _reference_forward_full(feat_bg, feat_id, feat_mo, params):
    """Float64, un-fused, full-precision reference (mirrors the PyTorch path)."""
    p = {k: np.asarray(v, np.float64) for k, v in params.items()}
    cb = p["codebook"]
    ref = {}
    for name, feat in (("bg", feat_bg), ("id", feat_id), ("mo", feat_mo)):
        f = np.asarray(feat, np.float64)
        b, t, c, h, w = f.shape
        x = f.reshape(b * t, c, h * w).transpose(0, 2, 1).reshape(-1, c)     # [P, C]
        e = x @ p[f"wpre_{name}"] + p[f"bpre_{name}"]                        # [P, E]
        d = ((e ** 2).sum(1, keepdims=True) + (cb ** 2).sum(1)[None, :]
             - 2.0 * (e @ cb.T))
        idx = np.argmin(d, axis=1)
        q = cb[idx]
        loss = COMMITMENT_COST * np.mean((q - e) ** 2)
        out = q @ p[f"wsuf_{name}"] + p[f"bsuf_{name}"]                      # [P, Hh]
        Hh = out.shape[1]
        ref[f"quantize_{name}"] = (out.reshape(b * t, h, w, Hh)
                                      .transpose(0, 3, 1, 2)
                                      .reshape(b, t, Hh, h, w))
        ref[f"tokens_{name}"] = idx.reshape(b * t, h, w)
        ref[f"quant_loss_{name}"] = loss
    return ref


def _reference_forward_matched(feat_bg, feat_id, feat_mo, params):
    """Precision-matched reference: same fused weights, same bf16 input rounding
    as the kernel, but computed in float64 — validates the kernel machinery."""
    cb = params["codebook"]
    K, E = cb.shape
    cbsq = jnp.sum(cb * cb, axis=1, keepdims=True)
    ref = {}
    for name, feat in (("bg", feat_bg), ("id", feat_id), ("mo", feat_mo)):
        wcat, bcat, dect = _prep_branch_weights(params, name, cb, cbsq)
        wcat_bf = np.asarray(wcat.astype(jnp.bfloat16).astype(jnp.float32), np.float64)
        bcat64 = np.asarray(bcat, np.float64)
        dect64 = np.asarray(dect, np.float64)
        b, t, c, h, w = feat.shape
        x = np.asarray(feat.astype(jnp.bfloat16).astype(jnp.float32), np.float64)
        x = x.reshape(b * t, c, h * w)                                        # [n, C, hw]
        r = np.einsum("rc,ncp->nrp", wcat_bf, x) + bcat64[None]
        e = r[:, :E, :]
        half = r[:, E:, :]
        d = (e ** 2).sum(1, keepdims=True) - 2.0 * half                       # [n, K, hw]
        idx = np.argmin(d, axis=1)                                            # [n, hw]
        d_min = np.maximum(np.min(d, axis=1), 0.0)
        out = np.transpose(dect64[:, idx], (1, 0, 2))                         # [n, Hh, hw]
        Hh = dect64.shape[0]
        P = b * t * h * w
        ref[f"quantize_{name}"] = out.reshape(b, t, Hh, h, w)
        ref[f"tokens_{name}"] = idx.reshape(b * t, h, w)
        ref[f"quant_loss_{name}"] = COMMITMENT_COST * d_min.sum() / (P * E)
    return ref


if __name__ == "__main__":
    key = jax.random.PRNGKey(0)
    kp, kb, ki, km = jax.random.split(key, 4)

    B, T, h, w = 2, 4, 8, 8
    params = init_params(kp)
    # synthetic encoder outputs (background/identity use a single frame)
    feat_bg = jax.random.normal(kb, (B, 1, NUM_HIDDENS, h, w), jnp.float32)
    feat_id = jax.random.normal(ki, (B, 1, NUM_HIDDENS, h, w), jnp.float32)
    feat_mo = jax.random.normal(km, (B, T, NUM_HIDDENS, h, w), jnp.float32)

    fwd = jax.jit(vqvae_quantize_forward)
    out = fwd(feat_bg, feat_id, feat_mo, params)
    jax.block_until_ready(out)

    # shape sanity
    assert out["quantize_bg"].shape == (B, 1, NUM_HIDDENS, h, w)
    assert out["quantize_id"].shape == (B, 1, NUM_HIDDENS, h, w)
    assert out["quantize_mo"].shape == (B, T, NUM_HIDDENS, h, w)
    assert out["tokens_bg"].shape == (B * 1, h, w)
    assert out["tokens_mo"].shape == (B * T, h, w)

    ref_m = _reference_forward_matched(feat_bg, feat_id, feat_mo, params)
    ref_f = _reference_forward_full(feat_bg, feat_id, feat_mo, params)
    for name in ("bg", "id", "mo"):
        tok = np.asarray(out[f"tokens_{name}"])
        q = np.asarray(out[f"quantize_{name}"], np.float64)
        b_, t_ = q.shape[0], q.shape[1]
        l = float(out[f"quant_loss_{name}"])

        # strict check vs the precision-matched (bf16-aware) reference
        mt = (tok == ref_m[f"tokens_{name}"])
        assert mt.mean() >= 0.97, f"matched-token mismatch ({name}): {mt.mean():.3f}"
        mask = mt.reshape(b_, t_, 1, h, w)
        assert float(np.max(np.abs(q - ref_m[f"quantize_{name}"]) * mask)) < 1e-3, \
            f"quantize diff vs matched ref ({name})"
        lm = float(ref_m[f"quant_loss_{name}"])
        assert abs(l - lm) <= 1e-3 * max(abs(lm), 1e-6) + 1e-5, f"loss diff matched ({name})"

        # loose semantic check vs the full-precision float64 module reference
        # (bf16 MXU operands flip a small fraction of near-tie tokens).
        mf = (tok == ref_f[f"tokens_{name}"])
        assert mf.mean() >= 0.75, f"token mismatch vs f64 ref ({name}): {mf.mean():.3f}"
        maskf = mf.reshape(b_, t_, 1, h, w)
        assert float(np.max(np.abs(q - ref_f[f"quantize_{name}"]) * maskf)) < 1e-3, \
            f"quantize diff vs f64 ref ({name})"
        lf = float(ref_f[f"quant_loss_{name}"])
        assert abs(l - lf) <= 0.1 * max(abs(lf), 1e-6) + 1e-4, f"loss diff vs f64 ref ({name})"

    print("KERNEL_OK")
</pallas_src>

<mosaic_0001>
module attributes {stable_mosaic.version = 11 : i64} {
  func.func @_fused_vq_kernel(%arg0: i32, %arg1: i32, %arg2: memref<6xi32, #tpu.memory_space<smem>>, %arg3: memref<2x32x128xbf16, #tpu.memory_space<vmem>>, %arg4: memref<3x80x32xbf16, #tpu.memory_space<vmem>>, %arg5: memref<3x80x1xf32, #tpu.memory_space<vmem>>, %arg6: memref<3x32x64xf32, #tpu.memory_space<vmem>>, %arg7: memref<2x32x128xf32, #tpu.memory_space<vmem>>, %arg8: memref<2x1x128xi32, #tpu.memory_space<vmem>>, %arg9: memref<2x1x128xf32, #tpu.memory_space<vmem>>) attributes {dimension_semantics = [#tpu.dimension_semantics<parallel>, #tpu.dimension_semantics<parallel>], iteration_bounds = array<i64: 6, 1>, scalar_prefetch = 1 : i64, scratch_operands = 0 : i64, tpu.core_type = #tpu.core_type<tc>, window_params = [{transform_indices = @transform_0, window_bounds = array<i64: 2, 32, 128>}, {pipeline_mode = #tpu.pipeline_mode<synchronous>, transform_indices = @transform_1, window_bounds = array<i64: 3, 80, 32>}, {pipeline_mode = #tpu.pipeline_mode<synchronous>, transform_indices = @transform_2, window_bounds = array<i64: 3, 80, 1>}, {pipeline_mode = #tpu.pipeline_mode<synchronous>, transform_indices = @transform_3, window_bounds = array<i64: 3, 32, 64>}, {transform_indices = @transform_4, window_bounds = array<i64: 2, 32, 128>}, {transform_indices = @transform_5, window_bounds = array<i64: 2, 1, 128>}, {transform_indices = @transform_6, window_bounds = array<i64: 2, 1, 128>}]} {
    %0 = arith.index_cast %arg0 : i32 to index
    %1 = memref.load %arg2[%0] : memref<6xi32, #tpu.memory_space<smem>>
    %2 = arith.index_cast %1 : i32 to index
    %c0 = arith.constant 0 : index
    %c0_0 = arith.constant 0 : index
    %3 = vector.load %arg4[%2, %c0, %c0_0] : memref<3x80x32xbf16, #tpu.memory_space<vmem>>, vector<1x80x32xbf16>
    %4 = vector.shape_cast %3 : vector<1x80x32xbf16> to vector<80x32xbf16>
    %5 = arith.index_cast %1 : i32 to index
    %c0_1 = arith.constant 0 : index
    %c0_2 = arith.constant 0 : index
    %6 = vector.load %arg5[%5, %c0_1, %c0_2] : memref<3x80x1xf32, #tpu.memory_space<vmem>>, vector<1x80x1xf32>
    %7 = vector.shape_cast %6 : vector<1x80x1xf32> to vector<80x1xf32>
    %8 = arith.index_cast %1 : i32 to index
    %c0_3 = arith.constant 0 : index
    %c0_4 = arith.constant 0 : index
    %9 = vector.load %arg6[%8, %c0_3, %c0_4] : memref<3x32x64xf32, #tpu.memory_space<vmem>>, vector<1x32x64xf32>
    %10 = vector.shape_cast %9 : vector<1x32x64xf32> to vector<32x64xf32>
    %c0_5 = arith.constant 0 : index
    %c0_6 = arith.constant 0 : index
    %c0_7 = arith.constant 0 : index
    %11 = vector.load %arg3[%c0_5, %c0_6, %c0_7] : memref<2x32x128xbf16, #tpu.memory_space<vmem>>, vector<1x32x128xbf16>
    %12 = vector.shape_cast %11 : vector<1x32x128xbf16> to vector<32x128xbf16>
    %cst = arith.constant dense<0.000000e+00> : vector<80x128xf32>
    %13 = tpu.matmul %4, %12, %cst {dimension_numbers = #tpu.dot_dimension_numbers<[1], [0], [0], [1], [0, 0, 1, 1], [], []>} : vector<80x32xbf16>, vector<32x128xbf16>, vector<80x128xf32> -> vector<80x128xf32>
    %14 = vector.broadcast %7 : vector<80x1xf32> to vector<80x128xf32>
    %15 = arith.addf %13, %14 : vector<80x128xf32>
    %16 = vector.extract_strided_slice %15 {offsets = [0, 0], sizes = [16, 128], strides = [1, 1]} : vector<80x128xf32> to vector<16x128xf32>
    %17 = vector.extract_strided_slice %15 {offsets = [16, 0], sizes = [64, 128], strides = [1, 1]} : vector<80x128xf32> to vector<64x128xf32>
    %18 = arith.mulf %16, %16 : vector<16x128xf32>
    %cst_8 = arith.constant dense<0.000000e+00> : vector<128xf32>
    %19 = vector.multi_reduction <add>, %18, %cst_8 [0] : vector<16x128xf32> to vector<128xf32>
    %20 = vector.shape_cast %19 : vector<128xf32> to vector<1x128xf32>
    %cst_9 = arith.constant 2.000000e+00 : f32
    %21 = vector.broadcast %cst_9 : f32 to vector<64x128xf32>
    %22 = arith.mulf %21, %17 : vector<64x128xf32>
    %23 = vector.broadcast %20 : vector<1x128xf32> to vector<64x128xf32>
    %24 = arith.subf %23, %22 : vector<64x128xf32>
    %cst_10 = arith.constant dense<0x7F800000> : vector<128xf32>
    %25 = vector.multi_reduction <minimumf>, %24, %cst_10 [0] : vector<64x128xf32> to vector<128xf32>
    %26 = vector.shape_cast %25 : vector<128xf32> to vector<1x128xf32>
    %27 = tpu.iota {dimensions = array<i32: 0>} : vector<64x128xi32>
    %28 = vector.broadcast %26 : vector<1x128xf32> to vector<64x128xf32>
    %29 = arith.cmpf oeq, %24, %28 : vector<64x128xf32>
    %c64_i32 = arith.constant 64 : i32
    %30 = vector.broadcast %c64_i32 : i32 to vector<64x128xi32>
    %31 = arith.select %29, %27, %30 : vector<64x128xi1>, vector<64x128xi32>
    %cst_11 = arith.constant dense<2147483647> : vector<128xi32>
    %32 = vector.multi_reduction <minsi>, %31, %cst_11 [0] : vector<64x128xi32> to vector<128xi32>
    %33 = vector.shape_cast %32 : vector<128xi32> to vector<1x128xi32>
    %34 = vector.broadcast %33 : vector<1x128xi32> to vector<64x128xi32>
    %35 = arith.cmpi eq, %27, %34 : vector<64x128xi32>
    %36 = arith.extui %35 : vector<64x128xi1> to vector<64x128xi32>
    %37 = arith.sitofp %36 : vector<64x128xi32> to vector<64x128xf32>
    %cst_12 = arith.constant dense<0.000000e+00> : vector<32x128xf32>
    %38 = tpu.matmul %10, %37, %cst_12 {dimension_numbers = #tpu.dot_dimension_numbers<[1], [0], [0], [1], [0, 0, 1, 1], [], []>} : vector<32x64xf32>, vector<64x128xf32>, vector<32x128xf32> -> vector<32x128xf32>
    %c0_13 = arith.constant 0 : index
    %c0_14 = arith.constant 0 : index
    %c0_15 = arith.constant 0 : index
    %39 = vector.load %arg7[%c0_13, %c0_14, %c0_15] : memref<2x32x128xf32, #tpu.memory_space<vmem>>, vector<1x32x128xf32>
    %40 = vector.shape_cast %39 : vector<1x32x128xf32> to vector<32x128xf32>
    %41 = vector.shape_cast %38 : vector<32x128xf32> to vector<1x32x128xf32>
    tpu.vector_store %arg7[%c0_13, %c0_14, %c0_15], %41 {strides = array<i32>} : memref<2x32x128xf32, #tpu.memory_space<vmem>>, vector<1x32x128xf32>,
    %c0_16 = arith.constant 0 : index
    %c0_17 = arith.constant 0 : index
    %c0_18 = arith.constant 0 : index
    %42 = vector.load %arg8[%c0_16, %c0_17, %c0_18] : memref<2x1x128xi32, #tpu.memory_space<vmem>>, vector<1x1x128xi32>
    %43 = vector.shape_cast %42 : vector<1x1x128xi32> to vector<1x128xi32>
    %44 = vector.shape_cast %33 : vector<1x128xi32> to vector<1x1x128xi32>
    tpu.vector_store %arg8[%c0_16, %c0_17, %c0_18], %44 {strides = array<i32>} : memref<2x1x128xi32, #tpu.memory_space<vmem>>, vector<1x1x128xi32>,
    %cst_19 = arith.constant 0.000000e+00 : f32
    %45 = vector.broadcast %cst_19 : f32 to vector<1x128xf32>
    %46 = arith.maximumf %26, %45 : vector<1x128xf32>
    %c0_20 = arith.constant 0 : index
    %c0_21 = arith.constant 0 : index
    %c0_22 = arith.constant 0 : index
    %47 = vector.load %arg9[%c0_20, %c0_21, %c0_22] : memref<2x1x128xf32, #tpu.memory_space<vmem>>, vector<1x1x128xf32>
    %48 = vector.shape_cast %47 : vector<1x1x128xf32> to vector<1x128xf32>
    %49 = vector.shape_cast %46 : vector<1x128xf32> to vector<1x1x128xf32>
    tpu.vector_store %arg9[%c0_20, %c0_21, %c0_22], %49 {strides = array<i32>} : memref<2x1x128xf32, #tpu.memory_space<vmem>>, vector<1x1x128xf32>,
    %c1 = arith.constant 1 : index
    %c0_23 = arith.constant 0 : index
    %c0_24 = arith.constant 0 : index
    %50 = vector.load %arg3[%c1, %c0_23, %c0_24] : memref<2x32x128xbf16, #tpu.memory_space<vmem>>, vector<1x32x128xbf16>
    %51 = vector.shape_cast %50 : vector<1x32x128xbf16> to vector<32x128xbf16>
    %cst_25 = arith.constant dense<0.000000e+00> : vector<80x128xf32>
    %52 = tpu.matmul %4, %51, %cst_25 {dimension_numbers = #tpu.dot_dimension_numbers<[1], [0], [0], [1], [0, 0, 1, 1], [], []>} : vector<80x32xbf16>, vector<32x128xbf16>, vector<80x128xf32> -> vector<80x128xf32>
    %53 = vector.broadcast %7 : vector<80x1xf32> to vector<80x128xf32>
    %54 = arith.addf %52, %53 : vector<80x128xf32>
    %55 = vector.extract_strided_slice %54 {offsets = [0, 0], sizes = [16, 128], strides = [1, 1]} : vector<80x128xf32> to vector<16x128xf32>
    %56 = vector.extract_strided_slice %54 {offsets = [16, 0], sizes = [64, 128], strides = [1, 1]} : vector<80x128xf32> to vector<64x128xf32>
    %57 = arith.mulf %55, %55 : vector<16x128xf32>
    %cst_26 = arith.constant dense<0.000000e+00> : vector<128xf32>
    %58 = vector.multi_reduction <add>, %57, %cst_26 [0] : vector<16x128xf32> to vector<128xf32>
    %59 = vector.shape_cast %58 : vector<128xf32> to vector<1x128xf32>
    %cst_27 = arith.constant 2.000000e+00 : f32
    %60 = vector.broadcast %cst_27 : f32 to vector<64x128xf32>
    %61 = arith.mulf %60, %56 : vector<64x128xf32>
    %62 = vector.broadcast %59 : vector<1x128xf32> to vector<64x128xf32>
    %63 = arith.subf %62, %61 : vector<64x128xf32>
    %cst_28 = arith.constant dense<0x7F800000> : vector<128xf32>
    %64 = vector.multi_reduction <minimumf>, %63, %cst_28 [0] : vector<64x128xf32> to vector<128xf32>
    %65 = vector.shape_cast %64 : vector<128xf32> to vector<1x128xf32>
    %66 = tpu.iota {dimensions = array<i32: 0>} : vector<64x128xi32>
    %67 = vector.broadcast %65 : vector<1x128xf32> to vector<64x128xf32>
    %68 = arith.cmpf oeq, %63, %67 : vector<64x128xf32>
    %c64_i32_29 = arith.constant 64 : i32
    %69 = vector.broadcast %c64_i32_29 : i32 to vector<64x128xi32>
    %70 = arith.select %68, %66, %69 : vector<64x128xi1>, vector<64x128xi32>
    %cst_30 = arith.constant dense<2147483647> : vector<128xi32>
    %71 = vector.multi_reduction <minsi>, %70, %cst_30 [0] : vector<64x128xi32> to vector<128xi32>
    %72 = vector.shape_cast %71 : vector<128xi32> to vector<1x128xi32>
    %73 = vector.broadcast %72 : vector<1x128xi32> to vector<64x128xi32>
    %74 = arith.cmpi eq, %66, %73 : vector<64x128xi32>
    %75 = arith.extui %74 : vector<64x128xi1> to vector<64x128xi32>
    %76 = arith.sitofp %75 : vector<64x128xi32> to vector<64x128xf32>
    %cst_31 = arith.constant dense<0.000000e+00> : vector<32x128xf32>
    %77 = tpu.matmul %10, %76, %cst_31 {dimension_numbers = #tpu.dot_dimension_numbers<[1], [0], [0], [1], [0, 0, 1, 1], [], []>} : vector<32x64xf32>, vector<64x128xf32>, vector<32x128xf32> -> vector<32x128xf32>
    %c1_32 = arith.constant 1 : index
    %c0_33 = arith.constant 0 : index
    %c0_34 = arith.constant 0 : index
    %78 = vector.load %arg7[%c1_32, %c0_33, %c0_34] : memref<2x32x128xf32, #tpu.memory_space<vmem>>, vector<1x32x128xf32>
    %79 = vector.shape_cast %78 : vector<1x32x128xf32> to vector<32x128xf32>
    %80 = vector.shape_cast %77 : vector<32x128xf32> to vector<1x32x128xf32>
    tpu.vector_store %arg7[%c1_32, %c0_33, %c0_34], %80 {strides = array<i32>} : memref<2x32x128xf32, #tpu.memory_space<vmem>>, vector<1x32x128xf32>,
    %c1_35 = arith.constant 1 : index
    %c0_36 = arith.constant 0 : index
    %c0_37 = arith.constant 0 : index
    %81 = vector.load %arg8[%c1_35, %c0_36, %c0_37] : memref<2x1x128xi32, #tpu.memory_space<vmem>>, vector<1x1x128xi32>
    %82 = vector.shape_cast %81 : vector<1x1x128xi32> to vector<1x128xi32>
    %83 = vector.shape_cast %72 : vector<1x128xi32> to vector<1x1x128xi32>
    tpu.vector_store %arg8[%c1_35, %c0_36, %c0_37], %83 {strides = array<i32>} : memref<2x1x128xi32, #tpu.memory_space<vmem>>, vector<1x1x128xi32>,
    %cst_38 = arith.constant 0.000000e+00 : f32
    %84 = vector.broadcast %cst_38 : f32 to vector<1x128xf32>
    %85 = arith.maximumf %65, %84 : vector<1x128xf32>
    %c1_39 = arith.constant 1 : index
    %c0_40 = arith.constant 0 : index
    %c0_41 = arith.constant 0 : index
    %86 = vector.load %arg9[%c1_39, %c0_40, %c0_41] : memref<2x1x128xf32, #tpu.memory_space<vmem>>, vector<1x1x128xf32>
    %87 = vector.shape_cast %86 : vector<1x1x128xf32> to vector<1x128xf32>
    %88 = vector.shape_cast %85 : vector<1x128xf32> to vector<1x1x128xf32>
    tpu.vector_store %arg9[%c1_39, %c0_40, %c0_41], %88 {strides = array<i32>} : memref<2x1x128xf32, #tpu.memory_space<vmem>>, vector<1x1x128xf32>,
    return
  }
  func.func @transform_0(%arg0: i32, %arg1: i32, %arg2: memref<6xi32, #tpu.memory_space<smem>>) -> (i32, i32, i32) {
    %c0_i32 = arith.constant 0 : i32
    %c0_i32_0 = arith.constant 0 : i32
    return %arg0, %c0_i32, %arg1 : i32, i32, i32
  }
  func.func @transform_1(%arg0: i32, %arg1: i32, %arg2: memref<6xi32, #tpu.memory_space<smem>>) -> (i32, i32, i32) {
    %c0_i32 = arith.constant 0 : i32
    %c0_i32_0 = arith.constant 0 : i32
    %c0_i32_1 = arith.constant 0 : i32
    %c0_i32_2 = arith.constant 0 : i32
    return %c0_i32, %c0_i32_0, %c0_i32_1 : i32, i32, i32
  }
  func.func @transform_2(%arg0: i32, %arg1: i32, %arg2: memref<6xi32, #tpu.memory_space<smem>>) -> (i32, i32, i32) {
    %c0_i32 = arith.constant 0 : i32
    %c0_i32_0 = arith.constant 0 : i32
    %c0_i32_1 = arith.constant 0 : i32
    %c0_i32_2 = arith.constant 0 : i32
    return %c0_i32, %c0_i32_0, %c0_i32_1 : i32, i32, i32
  }
  func.func @transform_3(%arg0: i32, %arg1: i32, %arg2: memref<6xi32, #tpu.memory_space<smem>>) -> (i32, i32, i32) {
    %c0_i32 = arith.constant 0 : i32
    %c0_i32_0 = arith.constant 0 : i32
    %c0_i32_1 = arith.constant 0 : i32
    %c0_i32_2 = arith.constant 0 : i32
    return %c0_i32, %c0_i32_0, %c0_i32_1 : i32, i32, i32
  }
  func.func @transform_4(%arg0: i32, %arg1: i32, %arg2: memref<6xi32, #tpu.memory_space<smem>>) -> (i32, i32, i32) {
    %c0_i32 = arith.constant 0 : i32
    %c0_i32_0 = arith.constant 0 : i32
    return %arg0, %c0_i32, %arg1 : i32, i32, i32
  }
  func.func @transform_5(%arg0: i32, %arg1: i32, %arg2: memref<6xi32, #tpu.memory_space<smem>>) -> (i32, i32, i32) {
    %c0_i32 = arith.constant 0 : i32
    %c0_i32_0 = arith.constant 0 : i32
    return %arg0, %c0_i32, %arg1 : i32, i32, i32
  }
  func.func @transform_6(%arg0: i32, %arg1: i32, %arg2: memref<6xi32, #tpu.memory_space<smem>>) -> (i32, i32, i32) {
    %c0_i32 = arith.constant 0 : i32
    %c0_i32_0 = arith.constant 0 : i32
    return %arg0, %c0_i32, %arg1 : i32, i32, i32
  }
}

</mosaic_0001>

<bundles_post_ra>
// kernel: squeeze.6
= control target key start
LH: loop header
LB: loop body
LE: loop exit
PB: predicated region body
PF: predicated region fallthrough
CT: control target
= control target key end

     0   :  { %s135_s0 = inlined_call_operand.vmem [shape: s32[2,64], index: 0, kind: input, shape index: {}]   ;;  %s136_s1 = inlined_call_operand.hbm [shape: s32[2,8,8], index: 1, kind: output, shape index: {}]  }
   0x1   :  { %v5_v0 = vld [vmem:[%s135_s0] sm:$0x3] }
   0x2   :  { %6 = vst [vmem:[#allocation2] sm:$0x3] %v5_v0 }
   0x3   :  { %2 = vsyncpa [#allocation1], 0  ;;  %s94_s0 = smov 120   ;;  %s95_s8 = smov 104   ;;  %vm8_vm0 = vcmask 64512  }
   0x4   :  { %s96_s9 = smov 112   ;;  %s97_s10 = smov 96  }
   0x5   :  { %s98_s11 = smov 88   ;;  %s99_s12 = smov 80  }
   0x6   :  { %s100_s13 = smov 72   ;;  %s101_s14 = smov [#allocation0]  }
   0x7   :  { %s56_s15 = sshll.u32 %s101_s14, 4  ;;  %s57_s15 = int_to_ptr.vmem [resolvable:$true] %s56_s15 }
   0x8   :  { %s70_s16 = scalar_lea.vmem %s57_s15, 256  ;;  %p75_p1 = scmp.lt.s32.totalorder %s57_s15, %s57_s15 }
   0x9   :  { %v10_v1 = vld [vmem:[#allocation2] sm:$0x3]   ;;  %p71_p0 = scmp.ne.s32.totalorder %s57_s15, %s70_s16  ;;  %p76_p2 = scmp.lt.s32.totalorder %s70_s16, %s70_s16 }
   0xa   :  { %v22_v2 = vld [vmem:[#allocation2] sm:$0x3]   ;;  %11 = vrot.lane.b32.xlu0 %v10_v1, %s94_s0 }
   0xb   :  { %23 = vrot.lane.b32.xlu1 %v22_v2, %s95_s8  ;;  %v16_v3 = vld [vmem:[#allocation2] sm:$0x3]   ;;  %p77_p3 = por %p76_p2, %p75_p1 }
   0xc   :  { %v28_v4 = vld [vmem:[#allocation2] sm:$0x3]  }
   0xd   :  { %v7_v5 = vld [vmem:[#allocation2] sm:$0x3]   ;;  %p78_p4 = pnand %p77_p3, %p71_p0 }
   0xe   :  { %9 = vst.msk [vmem:[#allocation0] ss:$8 sm:$0x3] %vm8_vm0, %v7_v5   ;;  %17 = vrot.lane.b32.xlu0 %v16_v3, %s96_s9  ;;  %v34_v6 = vld [vmem:[#allocation2] sm:$0x3]  }
   0xf   :  { %29 = vrot.lane.b32.xlu1 %v28_v4, %s97_s10  ;;  %v40_v7 = vld [vmem:[#allocation2] sm:$0x3]  }
  0x10   :  { %v46_v8 = vld [vmem:[#allocation2] sm:$0x3]  }
  0x12   :  { %35 = vrot.lane.b32.xlu0 %v34_v6, %s98_s11 }
  0x13   :  { %41 = vrot.lane.b32.xlu1 %v40_v7, %s99_s12 }
  0x16   :  { %47 = vrot.lane.b32.xlu0 %v46_v8, %s100_s13 }
  0x7c   :  { %v12_v9 = vpop.permute.xlu0 %11  }
  0x7d   :  { %v24_v10 = vpop.permute.xlu1 %23   ;;  %15 = vst.msk [vmem:[#allocation0 + $0x1] ss:$8 sm:$0x3] %vm8_vm0, %v12_v9  }
  0x7e   :  { %27 = vst.msk [vmem:[#allocation0 + $0x3] ss:$8 sm:$0x3] %vm8_vm0, %v24_v10  }
  0x80   :  { %v18_v11 = vpop.permute.xlu0 %17  }
  0x81   :  { %v30_v12 = vpop.permute.xlu1 %29   ;;  %21 = vst.msk [vmem:[#allocation0 + $0x2] ss:$8 sm:$0x3] %vm8_vm0, %v18_v11  }
  0x82   :  { %33 = vst.msk [vmem:[#allocation0 + $0x4] ss:$8 sm:$0x3] %vm8_vm0, %v30_v12  }
  0x84   :  { %v36_v13 = vpop.permute.xlu0 %35  }
  0x85   :  { %v42_v14 = vpop.permute.xlu1 %41   ;;  %39 = vst.msk [vmem:[#allocation0 + $0x5] ss:$8 sm:$0x3] %vm8_vm0, %v36_v13  }
  0x86   :  { %45 = vst.msk [vmem:[#allocation0 + $0x6] ss:$8 sm:$0x3] %vm8_vm0, %v42_v14  }
  0x88   :  { %v48_v15 = vpop.permute.xlu0 %47  }
  0x89   :  { %51 = vst.msk [vmem:[#allocation0 + $0x7] ss:$8 sm:$0x3] %vm8_vm0, %v48_v15  }
  0x8a   :  { %81 = shalt.err (!%p78_p4)
}
  0x8b   :  { %s82_s19 = scalar_lea.hbm %s136_s1, 256 }
  0x8c   :  { %p83_p5 = scmp.ne.s32.totalorder %s136_s1, %s82_s19  ;;  %p86_p6 = scmp.lt.u32.totalorder %s82_s19, %s136_s1 }
  0x8e   :  { %p88_p7 = pnand %p86_p6, %p83_p5 }
  0x90   :  { %91 = shalt.err (!%p88_p7)
}
  0x91   :  { %59 = dma.vmem_to_hbm [thread:$0]  %s57_s15, 256, %s136_s1, [#allocation1]  }
  0x92   :  { %92 = dma.done.wait [#allocation1], 256  }
  0x93   :  { %93 = vsyncadd [#allocation1], 4294967040 }
  0x94   :  { %61 = vsyncpa [#allocation1], 1 }

// kernel: squeeze.10
= control target key start
LH: loop header
LB: loop body
LE: loop exit
PB: predicated region body
PF: predicated region fallthrough
CT: control target
= control target key end

     0   :  { %vm4_vm0 = vcmask 64512   ;;  %s154_s0 = inlined_call_operand.vmem [shape: s32[8,64], index: 0, kind: input, shape index: {}]   ;;  %s155_s1 = inlined_call_operand.hbm [shape: s32[8,8,8], index: 1, kind: output, shape index: {}]  }
   0x1   :  { %v7_v0 = vld [vmem:[%s154_s0] sm:$0xff]  }
   0x2   :  { %2 = vsyncpa [#allocation1], 0  ;;  %s105_s0 = smov 120   ;;  %s106_s8 = smov 104  }
   0x3   :  { %8 = vrot.lane.b32.xlu0 %v7_v0, %s105_s0  ;;  %24 = vrot.lane.b32.xlu1 %v7_v0, %s106_s8  ;;  %5 = vst.msk [vmem:[#allocation0] ss:$8 sm:$0xf] %vm4_vm0, %v7_v0   ;;  %6 = vst.msk [vmem:[#allocation0] ss:$8 sm:$0xf0] %vm4_vm0, %v7_v0  }
   0x4   :  { %s107_s9 = smov 112   ;;  %s108_s10 = smov 96  }
   0x5   :  { %s109_s11 = smov 88   ;;  %s110_s12 = smov 80  }
   0x6   :  { %s111_s13 = smov 72   ;;  %s112_s14 = smov [#allocation0]  }
   0x7   :  { %16 = vrot.lane.b32.xlu0 %v7_v0, %s107_s9  ;;  %32 = vrot.lane.b32.xlu1 %v7_v0, %s108_s10  ;;  %s67_s15 = sshll.u32 %s112_s14, 4  ;;  %s68_s15 = int_to_ptr.vmem [resolvable:$true] %s67_s15 }
   0x8   :  { %s81_s16 = scalar_lea.vmem %s68_s15, 1024  ;;  %p86_p1 = scmp.lt.s32.totalorder %s68_s15, %s68_s15 }
   0x9   :  { %p82_p0 = scmp.ne.s32.totalorder %s68_s15, %s81_s16  ;;  %p87_p2 = scmp.lt.s32.totalorder %s81_s16, %s81_s16 }
   0xb   :  { %40 = vrot.lane.b32.xlu0 %v7_v0, %s109_s11  ;;  %48 = vrot.lane.b32.xlu1 %v7_v0, %s110_s12  ;;  %p88_p3 = por %p87_p2, %p86_p1 }
   0xd   :  { %p89_p4 = pnand %p88_p3, %p82_p0 }
   0xf   :  { %56 = vrot.lane.b32.xlu0 %v7_v0, %s111_s13 }
  0x75   :  { %v9_v1 = vpop.permute.xlu0 %8   ;;  %v25_v2 = vpop.permute.xlu1 %24  }
  0x76   :  { %12 = vst.msk [vmem:[#allocation0 + $0x1] ss:$8 sm:$0xf] %vm4_vm0, %v9_v1   ;;  %14 = vst.msk [vmem:[#allocation0 + $0x1] ss:$8 sm:$0xf0] %vm4_vm0, %v9_v1  }
  0x77   :  { %28 = vst.msk [vmem:[#allocation0 + $0x3] ss:$8 sm:$0xf] %vm4_vm0, %v25_v2   ;;  %30 = vst.msk [vmem:[#allocation0 + $0x3] ss:$8 sm:$0xf0] %vm4_vm0, %v25_v2  }
  0x79   :  { %v17_v3 = vpop.permute.xlu0 %16   ;;  %v33_v4 = vpop.permute.xlu1 %32  }
  0x7a   :  { %20 = vst.msk [vmem:[#allocation0 + $0x2] ss:$8 sm:$0xf] %vm4_vm0, %v17_v3   ;;  %22 = vst.msk [vmem:[#allocation0 + $0x2] ss:$8 sm:$0xf0] %vm4_vm0, %v17_v3  }
  0x7b   :  { %36 = vst.msk [vmem:[#allocation0 + $0x4] ss:$8 sm:$0xf] %vm4_vm0, %v33_v4   ;;  %38 = vst.msk [vmem:[#allocation0 + $0x4] ss:$8 sm:$0xf0] %vm4_vm0, %v33_v4  }
  0x7d   :  { %v41_v5 = vpop.permute.xlu0 %40   ;;  %v49_v6 = vpop.permute.xlu1 %48  }
  0x7e   :  { %44 = vst.msk [vmem:[#allocation0 + $0x5] ss:$8 sm:$0xf] %vm4_vm0, %v41_v5   ;;  %46 = vst.msk [vmem:[#allocation0 + $0x5] ss:$8 sm:$0xf0] %vm4_vm0, %v41_v5  }
  0x7f   :  { %52 = vst.msk [vmem:[#allocation0 + $0x6] ss:$8 sm:$0xf] %vm4_vm0, %v49_v6   ;;  %54 = vst.msk [vmem:[#allocation0 + $0x6] ss:$8 sm:$0xf0] %vm4_vm0, %v49_v6  }
  0x81   :  { %v57_v7 = vpop.permute.xlu0 %56  }
  0x82   :  { %60 = vst.msk [vmem:[#allocation0 + $0x7] ss:$8 sm:$0xf] %vm4_vm0, %v57_v7   ;;  %62 = vst.msk [vmem:[#allocation0 + $0x7] ss:$8 sm:$0xf0] %vm4_vm0, %v57_v7  }
  0x83   :  { %92 = shalt.err (!%p89_p4)
}
  0x84   :  { %s93_s19 = scalar_lea.hbm %s155_s1, 1024 }
  0x85   :  { %p94_p5 = scmp.ne.s32.totalorder %s155_s1, %s93_s19  ;;  %p97_p6 = scmp.lt.u32.totalorder %s93_s19, %s155_s1 }
  0x87   :  { %p99_p7 = pnand %p97_p6, %p94_p5 }
  0x89   :  { %102 = shalt.err (!%p99_p7)
}
  0x8a   :  { %70 = dma.vmem_to_hbm [thread:$0]  %s68_s15, 1024, %s155_s1, [#allocation1]  }
  0x8b   :  { %103 = dma.done.wait [#allocation1], 1024  }
  0x8c   :  { %104 = vsyncadd [#allocation1], 4294966272 }
  0x8d   :  { %72 = vsyncpa [#allocation1], 1 }

// kernel: vqvae_quantize_forward.1
= control target key start
LH: loop header
LB: loop body
LE: loop exit
PB: predicated region body
PF: predicated region fallthrough
CT: control target
= control target key end

     0   :  { %s1886_s0 = inlined_call_operand.vmem [shape: s32[6], index: 0, kind: input, shape index: {}]   ;;  %s1887_s1 = inlined_call_operand.vmem [shape: bf16[12,32,128], index: 1, kind: input, shape index: {}]   ;;  %s1888_s2 = inlined_call_operand.vmem [shape: bf16[3,80,32], index: 2, kind: input, shape index: {}]   ;;  %s1889_s3 = inlined_call_operand.vmem [shape: f32[3,80,1], index: 3, kind: input, shape index: {}]   ;;  %s1890_s4 = inlined_call_operand.vmem [shape: f32[3,32,64], index: 4, kind: input, shape index: {}]   ;;  %s1891_s5 = inlined_call_operand.vmem [shape: f32[12,32,128], index: 5, kind: output, shape index: {0}]   ;;  %s1892_s6 = inlined_call_operand.vmem [shape: s32[12,1,128], index: 6, kind: output, shape index: {1}]   ;;  %s1893_s7 = inlined_call_operand.vmem [shape: f32[12,1,128], index: 7, kind: output, shape index: {2}]  }
   0x1   :  { %s13_s26 = sshll.u32 %s1886_s0, 4  ;;  %s14_s26 = int_to_ptr.vmem [resolvable:$true] %s13_s26 }
   0x2   :  { %s1511_s27 = scalar_lea.vmem %s14_s26, 16  ;;  %p1516_p1 = scmp.lt.s32.totalorder %s14_s26, %s14_s26 }
   0x3   :  { %p1512_p0 = scmp.ne.s32.totalorder %s14_s26, %s1511_s27  ;;  %p1517_p2 = scmp.lt.s32.totalorder %s1511_s27, %s1511_s27 }
   0x5   :  { %p1518_p3 = por %p1517_p2, %p1516_p1 }
   0x7   :  { %p1519_p4 = pnand %p1518_p3, %p1512_p0 }
   0x9   :  { %1522 = shalt.err (!%p1519_p4)  }
   0xa   :  { %s1549_s28 = smov [#allocation3]  }
   0xb   :  { %16 = dma.vmem_to_smem %s14_s26, 16, %s1549_s28, [#allocation2] }
   0xc   :  { %1535 = dma.done.wait [#allocation2], 16 }
   0xd   :  { %1536 = vsyncadd [#allocation2], 4294967280 }
   0xe   :  { %18 = sfence }
   0xf   :  { %s1597_s29 = smov 0   ;;  %s1599_s30 = smov 0  }
  0x10   :  { %s1601_s8 = smov 0  }
  0x11 LB: > { %s36_s0 = sadd.s32 1, %s1543_s30  ;;  %p1224_p5 = scmp.ge.s32.totalorder %s1547_s8, 1  ;;  %s1547_s8 = sphi %s1601_s8, %s24_s8   ;;  %s1543_s30 = sphi %s1599_s30, %s1895_s30   ;;  %s1539_s29 = sphi %s1597_s29, %s1894_s29  }
  0x12   : > { %p38_p6 = scmp.ge.s32.totalorder %s36_s0, 6  ;;  %p249_p7 = scmp.lt.s32.totalorder %s1547_s8, 7 }
  0x14   : > { %s1897_s0 = smov (%p38_p6, %s36_s0), 0  ;;  %p250_p8 = pnand %p1224_p5, %p249_p7 }
  0x15   : > { %s1225_s9 = sshll.u32 (!%p250_p8), %s1539_s29, 1  ;;  %s1615_s10 = sld [smem:[#allocation3 + %s1539_s29]] (!%p250_p8)  ;;  %v1550_v0 = vmov (!%p250_p8), 0.0   ;;  %vm1551_vm0 = vmmov (!%p250_p8), 0   ;;  %v1552_v1 = vmov (!%p250_p8), 0   ;;  %vm461_vm1 = vcmask (!%p250_p8), 261120  }
  0x16   : > { %253 = sbr.rel (%p250_p8) target bundleno = 888 (0x378), region = 36  ;;  %1347 = vmatprep.subr.bf16.mxu0 (!%p250_p8), %v1550_v0  ;;  %p302_p9 = scmp.lt.s32.totalorder (!%p250_p8), %s1225_s9, 11  ;;  %1351 = vmatprep.mubr.msk.bf16.mxu0 (!%p250_p8), %vm1551_vm0, %v1550_v0  ;;  %vm660_vm2 = vcmask (!%p250_p8), 523264  }
  0x17   : > { %1500 = vset.pattern.permute.xlu0 (!%p250_p8), %v1552_v1  ;;  %1501 = vset.pattern.permute.xlu1 (!%p250_p8), %v1552_v1 }
  0x1b   : > { %s1308_s15 = smul.u32 (!%p250_p8), 40, %s1615_s10  ;;  %s1234_s23 = sshll.u32 (!%p250_p8), %s1615_s10, 5 }
  0x1c   : > { %s352_s16 = smul.u32 (!%p250_p8), 80, %s1615_s10  ;;  %s1678_s26 = scalar_lea.vmem (!%p250_p8), %s1890_s4, %s1234_s23 }
  0x1d   : > { %s1899_s9 = smov (!%p302_p9, %s1225_s9), 11  ;;  %s1635_s19 = scalar_lea.vmem %s1888_s2, %s1308_s15  ;;  %v366_v19 = vld [vmem:[%s1678_s26] sm:$0xff] }
  0x1e   : > { %s1306_s11 = sshll.u32 %s1899_s9, 4  ;;  %v1639_v4 = vld [vmem:[%s1635_s19] sm:$0xff]   ;;  %s353_s22 = scalar_lea.vmem %s1889_s3, %s352_s16  ;;  %v1649_v9 = vld [vmem:[%s1635_s19 + $0x8] sm:$0xff]   ;;  %v1656_v14 = vld [vmem:[%s1635_s19 + $0x10] sm:$0xff]   ;;  %1387 = vmatprep.mubr.msk.f32.mxu1 %vm660_vm2, %v366_v19 }
  0x1f   : > { %s1626_s14 = scalar_lea.vmem %s1887_s1, %s1306_s11  ;;  %v354_v5 = vld [vmem:[%s353_s22] sm:$0xff]  ;;  %v356_v6 = vld [vmem:[%s353_s22 + $0x10] sm:$0xff]  ;;  %v355_v7 = vld [vmem:[%s353_s22 + $0x8] sm:$0xff]  ;;  %s1746_s29 = scalar_lea.vmem %s1893_s7, %s1899_s9 }
  0x20   : > { %v1502_v2 = vld [vmem:[%s1626_s14] sm:$0xff]   ;;  %v1503_v3 = vld [vmem:[%s1626_s14 + $0x8] sm:$0xff]   ;;  %376 = vperm.xlu0 %1500, %v354_v5   ;;  %386 = vperm.xlu1 %1501, %v356_v6   ;;  %v357_v8 = vld [vmem:[%s353_s22 + $0x18] sm:$0xff]  ;;  %s1763_s12 = scalar_lea.vmem %s1892_s6, %s1899_s9  ;;  %s1307_s13 = sshll.u32 %s1899_s9, 5 }
  0x21   : > { %1348 = vmatpush3.bf16.msra.mxu0 %v1502_v2  ;;  %v358_v10 = vld [vmem:[%s353_s22 + $0x20] sm:$0xff]  ;;  %v359_v11 = vld [vmem:[%s353_s22 + $0x28] sm:$0xff]  ;;  %v360_v12 = vld [vmem:[%s353_s22 + $0x30] sm:$0xff]  ;;  %s1825_s16 = scalar_lea.vmem %s1891_s5, %s1307_s13 }
  0x22   : > { %1349 = vmatprep.subr.bf16.mxu0 %v1550_v0  ;;  %v361_v13 = vld [vmem:[%s353_s22 + $0x38] sm:$0xff]  ;;  %v362_v15 = vld [vmem:[%s353_s22 + $0x40] sm:$0xff]  ;;  %v363_v16 = vld [vmem:[%s353_s22 + $0x48] sm:$0xff] }
  0x23   : > { %v1663_v17 = vld [vmem:[%s1635_s19 + $0x18] sm:$0xff]   ;;  %v1670_v18 = vld [vmem:[%s1635_s19 + $0x20] sm:$0xff]  }
  0x24   : > { %381 = vperm.xlu0 %1500, %v355_v7   ;;  %391 = vperm.xlu1 %1501, %v357_v8  }
  0x25   : > { %1350 = vmatpush3.bf16.msra.mxu0 %v1503_v3 }
  0x28   : > { %1352 = vmatmul.mubr.msk.bf16.vlgmr.msra.gmra.mrb[0].mxu0 %vm461_vm1, %v1639_v4  ;;  %396 = vperm.xlu0 %1500, %v358_v10  }
  0x29   : > { %1355 = vmatprep.mubr.msk.bf16.mxu0 %vm1551_vm0, %v1550_v0  ;;  %401 = vperm.xlu1 %1501, %v359_v11  }
  0x2c   : > { %406 = vperm.xlu0 %1500, %v360_v12  }
  0x2d   : > { %411 = vperm.xlu1 %1501, %v361_v13  }
  0x30   : > { %1356 = vmatmul.mubr.msk.bf16.gmra.mrb[4].mxu0 %vm461_vm1, %v1649_v9  ;;  %416 = vperm.xlu0 %1500, %v362_v15  }
  0x31   : > { %1359 = vmatprep.mubr.msk.bf16.mxu0 %vm1551_vm0, %v1550_v0  ;;  %421 = vperm.xlu1 %1501, %v363_v16  }
  0x38   : > { %1360 = vmatmul.mubr.msk.bf16.gmra.mrb[8].mxu0 %vm461_vm1, %v1656_v14 }
  0x39   : > { %1363 = vmatprep.mubr.msk.bf16.mxu0 %vm1551_vm0, %v1550_v0 }
  0x40   : > { %1364 = vmatmul.mubr.msk.bf16.gmra.mrb[12].mxu0 %vm461_vm1, %v1663_v17 }
  0x41   : > { %1367 = vmatprep.mubr.msk.bf16.mxu0 %vm1551_vm0, %v1550_v0 }
  0x48   : > { %1368 = vmatmul.mubr.msk.bf16.gmra.mrb[16].mxu0 %vm461_vm1, %v1670_v18 }
  0x49   : > { %1433 = vmatprep.mubr.msk.f32.mxu0 %vm660_vm2, %v366_v19 }
  0x9f   : > { %v1683_v20 = vpop.permute.xlu0 %376  ;;  %v1689_v30 = vpop.permute.xlu1 %386 }
  0xa3   : > { %v1685_v22 = vpop.permute.xlu0 %381  ;;  %v1691_v38 = vpop.permute.xlu1 %391 }
  0xa7   : > { %v1695_v43 = vpop.permute.xlu0 %396 }
  0xa8   : > { %v1698_v49 = vpop.permute.xlu1 %401 }
  0xab   : > { %v1705_v61 = vpop.permute.xlu0 %406 }
  0xac   : > { %v1708_v2 = vpop.permute.xlu1 %411 }
  0xaf   : > { %v1712_v13 = vpop.permute.xlu0 %416 }
  0xfb   : > { %v511_v21 = vpop.f32.mrb[0].mxu0 }
  0xfc   : > { %v512_v23 = vadd.f32 %v511_v21, %v1683_v20  ;;  %v1353_v24 = vpop.f32.mrb[1].mxu0 }
  0xfd   : > { %v514_v25 = vpop.f32.mrb[2].mxu0 }
  0xfe   : > { %v515_v26 = vadd.f32 %v514_v25, %v1685_v22  ;;  %v1354_v27 = vpop.f32.mrb[3].mxu0  ;;  %v550_v28 = vmul.f32 %v512_v23, %v512_v23  ;;  %v1716_v23 = vpop.permute.xlu1 %421 }
 0x100   : > { %v551_v29 = vmul.f32 %v515_v26, %v515_v26 }
 0x102   : > { %v552_v31 = vadd.f32 %v551_v29, %v550_v28 }
 0x103   : > { %v519_v32 = vpop.f32.mrb[4].mxu0 }
 0x104   : > { %v553_v33 = vrot.slane %v552_v31, 4  ;;  %v1357_v34 = vpop.f32.mrb[5].mxu0  ;;  %v520_v40 = vadd.f32 %v519_v32, %v1689_v30 }
 0x105   : > { %v522_v35 = vpop.f32.mrb[6].mxu0 }
 0x106   : > { %v554_v36 = vadd.f32 %v553_v33, %v552_v31  ;;  %v1358_v37 = vpop.f32.mrb[7].mxu0  ;;  %v523_v42 = vadd.f32 %v522_v35, %v1691_v38  ;;  %v559_v48 = vmul.f32 2.0, %v520_v40 }
 0x108   : > { %v555_v39 = vrot.slane %v554_v36, 2  ;;  %v560_v52 = vmul.f32 2.0, %v523_v42 }
 0x10a   : > { %v556_v41 = vadd.f32 %v555_v39, %v554_v36  ;;  %v588_v39 = vlaneseq }
 0x10b   : > { %v527_v44 = vpop.f32.mrb[8].mxu0 }
 0x10c   : > { %v557_v45 = vrot.slane %v556_v41, 1  ;;  %v528_v46 = vadd.f32 %v527_v44, %v1695_v43  ;;  %v1361_v47 = vpop.f32.mrb[9].mxu0  ;;  %v1719_v42 = vshrl.u32 %v588_v39, 7 }
 0x10d   : > { %v530_v50 = vpop.f32.mrb[10].mxu0 }
 0x10e   : > { %v558_v51 = vadd.f32 %v557_v45, %v556_v41  ;;  %v561_v53 = vmul.f32 2.0, %v528_v46  ;;  %v531_v54 = vadd.f32 %v530_v50, %v1698_v49  ;;  %v1362_v55 = vpop.f32.mrb[11].mxu0  ;;  %v1722_v46 = vadd.s32 16, %v1719_v42 }
 0x10f   : > { %v1725_v47 = vadd.s32 24, %v1719_v42  ;;  %v1731_v50 = vadd.s32 56, %v1719_v42 }
 0x110   : > { %v1701_v56 = vsub.f32 %v558_v51, %v559_v48  ;;  %v1703_v57 = vsub.f32 %v558_v51, %v560_v52  ;;  %v569_v58 = vsub.f32 %v558_v51, %v561_v53  ;;  %v562_v59 = vmul.f32 2.0, %v531_v54 }
 0x111   : > { %v1728_v48 = vadd.s32 48, %v1719_v42  ;;  %v1734_v52 = vadd.s32 8, %v1719_v42  ;;  %v1737_v53 = vadd.s32 32, %v1719_v42  ;;  %v1740_v54 = vadd.s32 40, %v1719_v42 }
 0x112   : > { %v570_v60 = vsub.f32 %v558_v51, %v562_v59 }
 0x113   : > { %v535_v62 = vpop.f32.mrb[12].mxu0 }
 0x114   : > { %v536_v63 = vadd.f32 %v535_v62, %v1705_v61  ;;  %v1365_v1 = vpop.f32.mrb[13].mxu0 }
 0x115   : > { %v538_v3 = vpop.f32.mrb[14].mxu0 }
 0x116   : > { %v563_v5 = vmul.f32 2.0, %v536_v63  ;;  %v539_v6 = vadd.f32 %v538_v3, %v1708_v2  ;;  %v1366_v7 = vpop.f32.mrb[15].mxu0 }
 0x118   : > { %v571_v8 = vsub.f32 %v558_v51, %v563_v5  ;;  %v564_v10 = vmul.f32 2.0, %v539_v6 }
 0x11a   : > { %v575_v11 = vmin.f32 %v1701_v56, %v571_v8  ;;  %v572_v12 = vsub.f32 %v558_v51, %v564_v10 }
 0x11b   : > { %v543_v15 = vpop.f32.mrb[16].mxu0 }
 0x11c   : > { %v576_v16 = vmin.f32 %v1703_v57, %v572_v12  ;;  %v544_v19 = vadd.f32 %v543_v15, %v1712_v13  ;;  %v1369_v21 = vpop.f32.mrb[17].mxu0 }
 0x11d   : > { %v546_v24 = vpop.f32.mrb[18].mxu0 }
 0x11e   : > { %v579_v25 = vmin.f32 %v575_v11, %v576_v16  ;;  %v565_v26 = vmul.f32 2.0, %v544_v19  ;;  %v547_v27 = vadd.f32 %v546_v24, %v1716_v23  ;;  %v1370_v28 = vpop.f32.mrb[19].mxu0 }
 0x11f   : > { %v1788_v28 = vld [vmem:[%s1678_s26 + $0x10] sm:$0xff] }
 0x120   : > { %v573_v29 = vsub.f32 %v558_v51, %v565_v26  ;;  %v566_v31 = vmul.f32 2.0, %v547_v27  ;;  %v1783_v26 = vld [vmem:[%s1678_s26 + $0x8] sm:$0xff]  ;;  %v1509_v27 = vld [vmem:[%s1626_s14 + $0x10] sm:$0xff]  }
 0x122   : > { %v577_v32 = vmin.f32 %v569_v58, %v573_v29  ;;  %v574_v33 = vsub.f32 %v558_v51, %v566_v31  ;;  %v1510_v31 = vld [vmem:[%s1626_s14 + $0x18] sm:$0xff]  }
 0x124   : > { %v578_v34 = vmin.f32 %v570_v60, %v574_v33 }
 0x126   : > { %v580_v35 = vmin.f32 %v577_v32, %v578_v34 }
 0x128   : > { %v581_v36 = vmin.f32 %v579_v25, %v580_v35  ;;  %v1553_v25 = vmov 1.0|1.0  }
 0x12a   : > { %v582_v37 = vrot.slane %v581_v36, 4 }
 0x12c   : > { %v583_v40 = vmin.f32 %v581_v36, %v582_v37 }
 0x12e   : > { %v584_v41 = vrot.slane %v583_v40, 2 }
 0x130   : > { %v585_v44 = vmin.f32 %v583_v40, %v584_v41 }
 0x132   : > { %v586_v45 = vrot.slane %v585_v44, 1 }
 0x134   : > { %v587_v51 = vmin.f32 %v585_v44, %v586_v45 }
 0x136   : > { %vm599_vm3 = vcmp.eq.f32.partialorder %v569_v58, %v587_v51  ;;  %vm600_vm4 = vcmp.eq.f32.partialorder %v570_v60, %v587_v51  ;;  %vm603_vm5 = vcmp.eq.f32.partialorder %v573_v29, %v587_v51  ;;  %vm604_vm6 = vcmp.eq.f32.partialorder %v574_v33, %v587_v51  ;;  %v1795_v29 = vld [vmem:[%s1678_s26 + $0x18] sm:$0xff] }
 0x137   : > { %v607_v55 = vsel %vm599_vm3, %v1722_v46, 64  ;;  %v608_v59 = vsel %vm600_vm4, %v1725_v47, 64  ;;  %v611_v62 = vsel %vm603_vm5, %v1728_v48, 64  ;;  %v612_v63 = vsel %vm604_vm6, %v1731_v50, 64 }
 0x138   : > { %vm617_vm7 = vcmp.lt.s32.totalorder %v607_v55, %v611_v62  ;;  %vm619_vm8 = vcmp.lt.s32.totalorder %v608_v59, %v612_v63  ;;  %v763_v58 = vmax.f32 %v587_v51, 0.0  ;;  %vm597_vm9 = vcmp.eq.f32.partialorder %v1701_v56, %v587_v51 }
 0x139   : > { %v618_v60 = vsel %vm617_vm7, %v607_v55, %v611_v62  ;;  %v620_v1 = vsel %vm619_vm8, %v608_v59, %v612_v63  ;;  %vm598_vm10 = vcmp.eq.f32.partialorder %v1703_v57, %v587_v51  ;;  %vm601_vm11 = vcmp.eq.f32.partialorder %v571_v8, %v587_v51 }
 0x13a   : > { %vm623_vm12 = vcmp.lt.s32.totalorder %v618_v60, %v620_v1  ;;  %764 = vst [vmem:[%s1746_s29] sm:$0x1] %v763_v58  ;;  %vm602_vm13 = vcmp.eq.f32.partialorder %v572_v12, %v587_v51  ;;  %v605_v3 = vsel %vm597_vm9, %v1719_v42, 64  ;;  %v606_v5 = vsel %vm598_vm10, %v1734_v52, 64 }
 0x13b   : > { %v624_v6 = vsel %vm623_vm12, %v618_v60, %v620_v1  ;;  %v609_v7 = vsel %vm601_vm11, %v1737_v53, 64  ;;  %v610_v10 = vsel %vm602_vm13, %v1740_v54, 64 }
 0x13c   : > { %vm613_vm14 = vcmp.lt.s32.totalorder %v605_v3, %v609_v7  ;;  %vm615_vm15 = vcmp.lt.s32.totalorder %v606_v5, %v610_v10 }
 0x13d   : > { %v614_v56 = vsel %vm613_vm14, %v605_v3, %v609_v7  ;;  %v616_v11 = vsel %vm615_vm15, %v606_v5, %v610_v10 }
 0x13e   : > { %vm621_vm3 = vcmp.lt.s32.totalorder %v614_v56, %v616_v11 }
 0x13f   : > { %v622_v57 = vsel %vm621_vm3, %v614_v56, %v616_v11 }
 0x140   : > { %vm625_vm4 = vcmp.lt.s32.totalorder %v622_v57, %v624_v6 }
 0x141   : > { %v626_v8 = vsel %vm625_vm4, %v622_v57, %v624_v6 }
 0x142   : > { %v627_v15 = vrot.slane %v626_v8, 4 }
 0x144   : > { %vm628_vm5 = vcmp.lt.s32.totalorder %v626_v8, %v627_v15 }
 0x145   : > { %v629_v12 = vsel %vm628_vm5, %v626_v8, %v627_v15 }
 0x146   : > { %v630_v16 = vrot.slane %v629_v12, 2 }
 0x148   : > { %vm631_vm6 = vcmp.lt.s32.totalorder %v629_v12, %v630_v16 }
 0x149   : > { %v632_v19 = vsel %vm631_vm6, %v629_v12, %v630_v16 }
 0x14a   : > { %v633_v21 = vrot.slane %v632_v19, 1 }
 0x14c   : > { %vm634_vm7 = vcmp.lt.s32.totalorder %v632_v19, %v633_v21 }
 0x14d   : > { %v635_v24 = vsel %vm634_vm7, %v632_v19, %v633_v21 }
 0x14e   : > { %vm636_vm8 = vcmp.eq.s32.totalorder %v1719_v42, %v635_v24  ;;  %vm637_vm9 = vcmp.eq.s32.totalorder %v1734_v52, %v635_v24  ;;  %762 = vst [vmem:[%s1763_s12] sm:$0x1] %v635_v24  ;;  %vm638_vm10 = vcmp.eq.s32.totalorder %v1722_v46, %v635_v24  ;;  %vm639_vm11 = vcmp.eq.s32.totalorder %v1725_v47, %v635_v24 }
 0x14f   : > { %vm1439_vm12 = vmpackc.low %vm637_vm9, %vm636_vm8  ;;  %vm640_vm14 = vcmp.eq.s32.totalorder %v1737_v53, %v635_v24  ;;  %vm641_vm15 = vcmp.eq.s32.totalorder %v1740_v54, %v635_v24  ;;  %vm642_vm4 = vcmp.eq.s32.totalorder %v1728_v48, %v635_v24  ;;  %vm643_vm5 = vcmp.eq.s32.totalorder %v1731_v50, %v635_v24 }
 0x150   : > { %1440 = vmatprep.subr.msk.bf16.mxu1 %vm1439_vm12, %v1553_v25  ;;  %vm1443_vm13 = vmpackc.low %vm639_vm11, %vm638_vm10 }
 0x151   : > { %1442 = vmatpush3.bf16.msk.msra.mxu1 %vm1439_vm12, %v1553_v25  ;;  %vm1447_vm3 = vmpackc.low %vm641_vm15, %vm640_vm14 }
 0x152   : > { %1444 = vmatprep.subr.msk.bf16.mxu1 %vm1443_vm13, %v1553_v25  ;;  %vm1451_vm6 = vmpackc.low %vm643_vm5, %vm642_vm4 }
 0x155   : > { %1446 = vmatpush3.bf16.msk.msra.mxu1 %vm1443_vm13, %v1553_v25 }
 0x156   : > { %1448 = vmatprep.subr.msk.bf16.mxu1 %vm1447_vm3, %v1553_v25 }
 0x159   : > { %1450 = vmatpush3.bf16.msk.msra.mxu1 %vm1447_vm3, %v1553_v25 }
 0x15a   : > { %1452 = vmatprep.subr.msk.bf16.mxu1 %vm1451_vm6, %v1553_v25 }
 0x15d   : > { %1454 = vmatpush3.bf16.msk.msra.mxu1 %vm1451_vm6, %v1553_v25 }
 0x15e   : > { %1393 = vmatprep.subr.bf16.mxu1 %v1550_v0 }
 0x160   : > { %1388 = vmatmul.mubr.msk.f32.vlgmr.msra.gmra.mrb[0].mxu1 %vm660_vm2, %v1783_v26 }
 0x161   : > { %1394 = vmatpush3.bf16.msra.mxu1 %v1509_v27  ;;  %1390 = vmatprep.mubr.msk.f32.mxu1 %vm660_vm2, %v1788_v28 }
 0x162   : > { %1395 = vmatprep.subr.bf16.mxu1 %v1550_v0 }
 0x164   : > { %1391 = vmatmul.mubr.msk.f32.gmra.mrb[2].mxu1 %vm660_vm2, %v1795_v29 }
 0x165   : > { %1396 = vmatpush3.bf16.msra.mxu1 %v1510_v31  ;;  %1397 = vmatprep.mubr.msk.bf16.mxu1 %vm1551_vm0, %v1550_v0 }
 0x168   : > { %1398 = vmatmul.mubr.msk.bf16.vlgmr.msra.gmra.mrb[4].mxu1 %vm461_vm1, %v1639_v4 }
 0x169   : > { %1401 = vmatprep.mubr.msk.bf16.mxu1 %vm1551_vm0, %v1550_v0 }
 0x170   : > { %1402 = vmatmul.mubr.msk.bf16.gmra.mrb[8].mxu1 %vm461_vm1, %v1649_v9 }
 0x171   : > { %1405 = vmatprep.mubr.msk.bf16.mxu1 %vm1551_vm0, %v1550_v0 }
 0x178   : > { %1406 = vmatmul.mubr.msk.bf16.gmra.mrb[12].mxu1 %vm461_vm1, %v1656_v14 }
 0x179   : > { %1409 = vmatprep.mubr.msk.bf16.mxu1 %vm1551_vm0, %v1550_v0 }
 0x180   : > { %1410 = vmatmul.mubr.msk.bf16.gmra.mrb[16].mxu1 %vm461_vm1, %v1663_v17 }
 0x181   : > { %1413 = vmatprep.mubr.msk.bf16.mxu1 %vm1551_vm0, %v1550_v0 }
 0x188   : > { %1414 = vmatmul.mubr.msk.bf16.gmra.mrb[20].mxu1 %vm461_vm1, %v1670_v18 }
 0x233   : > { %v1389_v4 = vpop.f32.mrb[0].mxu1 }
 0x234   : > { %759 = vst [vmem:[%s1825_s16 + $0x8] sm:$0xff] %v1389_v4  ;;  %v739_v9 = vpop.f32.mrb[1].mxu1 }
 0x235   : > { %758 = vst [vmem:[%s1825_s16] sm:$0xff] %v739_v9 }
 0x237   : > { %v1392_v14 = vpop.f32.mrb[2].mxu1 }
 0x238   : > { %761 = vst [vmem:[%s1825_s16 + $0x18] sm:$0xff] %v1392_v14  ;;  %v749_v0 = vpop.f32.mrb[3].mxu1 }
 0x239   : > { %760 = vst [vmem:[%s1825_s16 + $0x10] sm:$0xff] %v749_v0 }
 0x23b   : > { %v816_v17 = vpop.f32.mrb[4].mxu1 }
 0x23c   : > { %v817_v18 = vadd.f32 %v816_v17, %v1683_v20  ;;  %v1399_v32 = vpop.f32.mrb[5].mxu1 }
 0x23d   : > { %v819_v33 = vpop.f32.mrb[6].mxu1 }
 0x23e   : > { %v820_v34 = vadd.f32 %v819_v33, %v1685_v22  ;;  %v1400_v35 = vpop.f32.mrb[7].mxu1  ;;  %v855_v36 = vmul.f32 %v817_v18, %v817_v18 }
 0x240   : > { %v856_v37 = vmul.f32 %v820_v34, %v820_v34 }
 0x242   : > { %v857_v39 = vadd.f32 %v856_v37, %v855_v36 }
 0x243   : > { %v824_v40 = vpop.f32.mrb[8].mxu1 }
 0x244   : > { %v858_v41 = vrot.slane %v857_v39, 4  ;;  %v1403_v44 = vpop.f32.mrb[9].mxu1  ;;  %v825_v62 = vadd.f32 %v824_v40, %v1689_v30 }
 0x245   : > { %v827_v45 = vpop.f32.mrb[10].mxu1 }
 0x246   : > { %v859_v51 = vadd.f32 %v858_v41, %v857_v39  ;;  %v1404_v55 = vpop.f32.mrb[11].mxu1  ;;  %v828_v20 = vadd.f32 %v827_v45, %v1691_v38  ;;  %v864_v3 = vmul.f32 2.0, %v825_v62 }
 0x248   : > { %v860_v59 = vrot.slane %v859_v51, 2  ;;  %v865_v7 = vmul.f32 2.0, %v828_v20 }
 0x24a   : > { %v861_v63 = vadd.f32 %v860_v59, %v859_v51 }
 0x24b   : > { %v832_v58 = vpop.f32.mrb[12].mxu1 }
 0x24c   : > { %v862_v60 = vrot.slane %v861_v63, 1  ;;  %v833_v22 = vadd.f32 %v832_v58, %v1695_v43  ;;  %v1407_v1 = vpop.f32.mrb[13].mxu1 }
 0x24d   : > { %v835_v5 = vpop.f32.mrb[14].mxu1 }
 0x24e   : > { %v863_v6 = vadd.f32 %v862_v60, %v861_v63  ;;  %v866_v10 = vmul.f32 2.0, %v833_v22  ;;  %v836_v56 = vadd.f32 %v835_v5, %v1698_v49  ;;  %v1408_v11 = vpop.f32.mrb[15].mxu1 }
 0x250   : > { %v872_v57 = vsub.f32 %v863_v6, %v864_v3  ;;  %v873_v8 = vsub.f32 %v863_v6, %v865_v7  ;;  %v874_v15 = vsub.f32 %v863_v6, %v866_v10  ;;  %v867_v30 = vmul.f32 2.0, %v836_v56 }
 0x252   : > { %v875_v12 = vsub.f32 %v863_v6, %v867_v30 }
 0x253   : > { %v840_v16 = vpop.f32.mrb[16].mxu1 }
 0x254   : > { %v841_v38 = vadd.f32 %v840_v16, %v1705_v61  ;;  %v1411_v19 = vpop.f32.mrb[17].mxu1 }
 0x255   : > { %v843_v21 = vpop.f32.mrb[18].mxu1 }
 0x256   : > { %v868_v43 = vmul.f32 2.0, %v841_v38  ;;  %v844_v24 = vadd.f32 %v843_v21, %v1708_v2  ;;  %v1412_v27 = vpop.f32.mrb[19].mxu1 }
 0x258   : > { %v876_v31 = vsub.f32 %v863_v6, %v868_v43  ;;  %v869_v4 = vmul.f32 2.0, %v844_v24 }
 0x25a   : > { %v880_v9 = vmin.f32 %v872_v57, %v876_v31  ;;  %v877_v14 = vsub.f32 %v863_v6, %v869_v4 }
 0x25b   : > { %v848_v49 = vpop.f32.mrb[20].mxu1 }
 0x25c   : > { %v881_v0 = vmin.f32 %v873_v8, %v877_v14  ;;  %v849_v17 = vadd.f32 %v848_v49, %v1712_v13  ;;  %v1415_v18 = vpop.f32.mrb[21].mxu1 }
 0x25d   : > { %v851_v32 = vpop.f32.mrb[22].mxu1 }
 0x25e   : > { %v884_v33 = vmin.f32 %v880_v9, %v881_v0  ;;  %v870_v34 = vmul.f32 2.0, %v849_v17  ;;  %v852_v61 = vadd.f32 %v851_v32, %v1716_v23  ;;  %v1416_v35 = vpop.f32.mrb[23].mxu1 }
 0x260   : > { %v878_v36 = vsub.f32 %v863_v6, %v870_v34  ;;  %v871_v37 = vmul.f32 2.0, %v852_v61 }
 0x262   : > { %v882_v39 = vmin.f32 %v874_v15, %v878_v36  ;;  %v879_v2 = vsub.f32 %v863_v6, %v871_v37 }
 0x264   : > { %v883_v40 = vmin.f32 %v875_v12, %v879_v2 }
 0x266   : > { %v885_v41 = vmin.f32 %v882_v39, %v883_v40 }
 0x268   : > { %v886_v44 = vmin.f32 %v884_v33, %v885_v41 }
 0x26a   : > { %v887_v45 = vrot.slane %v886_v44, 4 }
 0x26c   : > { %v888_v51 = vmin.f32 %v886_v44, %v887_v45 }
 0x26e   : > { %v889_v55 = vrot.slane %v888_v51, 2 }
 0x270   : > { %v890_v59 = vmin.f32 %v888_v51, %v889_v55 }
 0x272   : > { %v891_v62 = vrot.slane %v890_v59, 1 }
 0x274   : > { %v892_v13 = vmin.f32 %v890_v59, %v891_v62 }
 0x276   : > { %vm893_vm0 = vcmp.eq.f32.partialorder %v872_v57, %v892_v13  ;;  %vm894_vm1 = vcmp.eq.f32.partialorder %v873_v8, %v892_v13  ;;  %vm895_vm7 = vcmp.eq.f32.partialorder %v874_v15, %v892_v13  ;;  %vm896_vm8 = vcmp.eq.f32.partialorder %v875_v12, %v892_v13 }
 0x277   : > { %vm897_vm9 = vcmp.eq.f32.partialorder %v876_v31, %v892_v13  ;;  %vm898_vm10 = vcmp.eq.f32.partialorder %v877_v14, %v892_v13  ;;  %vm899_vm11 = vcmp.eq.f32.partialorder %v878_v36, %v892_v13  ;;  %vm900_vm12 = vcmp.eq.f32.partialorder %v879_v2, %v892_v13 }
 0x278   : > { %v901_v23 = vsel %vm893_vm0, %v1719_v42, 64  ;;  %v902_v63 = vsel %vm894_vm1, %v1734_v52, 64  ;;  %v903_v20 = vsel %vm895_vm7, %v1722_v46, 64  ;;  %v904_v58 = vsel %vm896_vm8, %v1725_v47, 64 }
 0x279   : > { %v905_v60 = vsel %vm897_vm9, %v1737_v53, 64  ;;  %v906_v22 = vsel %vm898_vm10, %v1740_v54, 64  ;;  %v907_v1 = vsel %vm899_vm11, %v1728_v48, 64  ;;  %v908_v3 = vsel %vm900_vm12, %v1731_v50, 64 }
 0x27a   : > { %vm909_vm13 = vcmp.lt.s32.totalorder %v901_v23, %v905_v60  ;;  %vm911_vm14 = vcmp.lt.s32.totalorder %v902_v63, %v906_v22  ;;  %vm913_vm15 = vcmp.lt.s32.totalorder %v903_v20, %v907_v1  ;;  %vm915_vm3 = vcmp.lt.s32.totalorder %v904_v58, %v908_v3 }
 0x27b   : > { %v910_v5 = vsel %vm909_vm13, %v901_v23, %v905_v60  ;;  %v912_v6 = vsel %vm911_vm14, %v902_v63, %v906_v22  ;;  %v914_v7 = vsel %vm913_vm15, %v903_v20, %v907_v1  ;;  %v916_v10 = vsel %vm915_vm3, %v904_v58, %v908_v3 }
 0x27c   : > { %vm917_vm4 = vcmp.lt.s32.totalorder %v910_v5, %v912_v6  ;;  %vm919_vm5 = vcmp.lt.s32.totalorder %v914_v7, %v916_v10  ;;  %v1048_v56 = vmax.f32 %v892_v13, 0.0 }
 0x27d   : > { %v918_v11 = vsel %vm917_vm4, %v910_v5, %v912_v6  ;;  %v920_v57 = vsel %vm919_vm5, %v914_v7, %v916_v10 }
 0x27e   : > { %vm921_vm6 = vcmp.lt.s32.totalorder %v918_v11, %v920_v57  ;;  %1303 = vst [vmem:[%s1746_s29 + $0x1] sm:$0x1] %v1048_v56 }
 0x27f   : > { %v922_v8 = vsel %vm921_vm6, %v918_v11, %v920_v57 }
 0x280   : > { %v923_v15 = vrot.slane %v922_v8, 4 }
 0x282   : > { %vm924_vm0 = vcmp.lt.s32.totalorder %v922_v8, %v923_v15 }
 0x283   : > { %v925_v30 = vsel %vm924_vm0, %v922_v8, %v923_v15 }
 0x284   : > { %v926_v12 = vrot.slane %v925_v30, 2 }
 0x286   : > { %vm927_vm1 = vcmp.lt.s32.totalorder %v925_v30, %v926_v12 }
 0x287   : > { %v928_v16 = vsel %vm927_vm1, %v925_v30, %v926_v12 }
 0x288   : > { %v929_v38 = vrot.slane %v928_v16, 1 }
 0x28a   : > { %vm930_vm7 = vcmp.lt.s32.totalorder %v928_v16, %v929_v38 }
 0x28b   : > { %v931_v19 = vsel %vm930_vm7, %v928_v16, %v929_v38 }
 0x28c   : > { %1302 = vst [vmem:[%s1763_s12 + $0x1] sm:$0x1] %v931_v19  ;;  %vm932_vm8 = vcmp.eq.s32.totalorder %v1719_v42, %v931_v19  ;;  %vm933_vm9 = vcmp.eq.s32.totalorder %v1734_v52, %v931_v19  ;;  %vm934_vm10 = vcmp.eq.s32.totalorder %v1722_v46, %v931_v19  ;;  %vm935_vm11 = vcmp.eq.s32.totalorder %v1725_v47, %v931_v19 }
 0x28d   : > { %vm1455_vm12 = vmpackc.low %vm933_vm9, %vm932_vm8  ;;  %vm936_vm14 = vcmp.eq.s32.totalorder %v1737_v53, %v931_v19  ;;  %vm937_vm15 = vcmp.eq.s32.totalorder %v1740_v54, %v931_v19  ;;  %vm938_vm4 = vcmp.eq.s32.totalorder %v1728_v48, %v931_v19  ;;  %vm939_vm5 = vcmp.eq.s32.totalorder %v1731_v50, %v931_v19 }
 0x28e   : > { %1456 = vmatprep.subr.msk.bf16.mxu0 %vm1455_vm12, %v1553_v25  ;;  %vm1459_vm13 = vmpackc.low %vm935_vm11, %vm934_vm10 }
 0x28f   : > { %1458 = vmatpush3.bf16.msk.msra.mxu0 %vm1455_vm12, %v1553_v25  ;;  %vm1463_vm3 = vmpackc.low %vm937_vm15, %vm936_vm14 }
 0x290   : > { %1460 = vmatprep.subr.msk.bf16.mxu0 %vm1459_vm13, %v1553_v25  ;;  %vm1467_vm6 = vmpackc.low %vm939_vm5, %vm938_vm4 }
 0x293   : > { %1462 = vmatpush3.bf16.msk.msra.mxu0 %vm1459_vm13, %v1553_v25 }
 0x294   : > { %1464 = vmatprep.subr.msk.bf16.mxu0 %vm1463_vm3, %v1553_v25 }
 0x297   : > { %1466 = vmatpush3.bf16.msk.msra.mxu0 %vm1463_vm3, %v1553_v25 }
 0x298   : > { %1468 = vmatprep.subr.msk.bf16.mxu0 %vm1467_vm6, %v1553_v25 }
 0x29b   : > { %1470 = vmatpush3.bf16.msk.msra.mxu0 %vm1467_vm6, %v1553_v25 }
 0x29e   : > { %1434 = vmatmul.mubr.msk.f32.vlgmr.msra.gmra.mrb[20].mxu0 %vm660_vm2, %v1783_v26 }
 0x29f   : > { %1436 = vmatprep.mubr.msk.f32.mxu0 %vm660_vm2, %v1788_v28 }
 0x2a2   : > { %1437 = vmatmul.mubr.msk.f32.gmra.mrb[22].mxu0 %vm660_vm2, %v1795_v29 }
 0x371   : > { %v1435_v42 = vpop.f32.mrb[20].mxu0 }
 0x372   : > { %1299 = vst [vmem:[%s1825_s16 + $0x28] sm:$0xff] %v1435_v42  ;;  %v1022_v46 = vpop.f32.mrb[21].mxu0 }
 0x373   : > { %1298 = vst [vmem:[%s1825_s16 + $0x20] sm:$0xff] %v1022_v46 }
 0x375   : > { %v1438_v47 = vpop.f32.mrb[22].mxu0 }
 0x376   : > { %1301 = vst [vmem:[%s1825_s16 + $0x38] sm:$0xff] %v1438_v47  ;;  %v1032_v48 = vpop.f32.mrb[23].mxu0 }
 0x377   : > { %1300 = vst [vmem:[%s1825_s16 + $0x30] sm:$0xff] %v1032_v48 }
 0x378 PF: > { %s24_s8 = sadd.s32 1, %s1547_s8   ;;  %s1894_s29 = smov %s1543_s30 }
 0x379   : > { %p21_p10 = scmp.ge.s32.totalorder %s24_s8, 8   ;;  %s1895_s30 = smov %s1897_s0 }
 0x37b   :  { %23 = sbr.rel (!%p21_p10) target bundleno = 17 (0x11), region = 97 }

</bundles_post_ra>
